<compile_context>
chip_gen: v5e
topology: v5e:2x2
jax: 0.10.0
libtpu: 0.0.40
codegen_flags: <defaults>
</compile_context>

<pallas_src>
import jax
import jax.numpy as jnp
from jax.experimental import pallas as pl
from jax.experimental.pallas import tpu as pltpu

EMBEDDING_DIM = 48
CIN = 3                       # conv1 input channels
C1 = 64                       # conv1 output channels
C2 = 64                       # conv2 output channels
_SHIFTS = ((0, 0), (0, 1), (1, 0), (1, 1))   # (kh, kw) of the 2x2 kernel


def _round_up(x, m):
    return (x + m - 1) // m * m


# ------------------------------ geometry ------------------------------------

def _geometry(H, W):
    """Static sizes for the fused forward (kernel=2, pad=1, pool=2 floor-mode)."""
    OH1, OW1 = H + 1, W + 1            # conv1 full output size
    PH1, PW1 = OH1 // 2, OW1 // 2      # after maxpool(2,2)
    NR1, NC1 = 2 * PH1, 2 * PW1        # conv1 region actually consumed by the pool
    PH2, PW2 = (PH1 + 1) // 2, (PW1 + 1) // 2   # pooled conv2 size
    NROW2 = 2 * PH2                    # conv2 rows actually consumed by the pool
    Wp2 = _round_up(PW1 + 2, 8)        # padded row stride of conv2's input buffer
    A_OFF = (-(Wp2 + 1)) % 8           # makes interior-row writes 8-sublane aligned
    NFULL2 = NROW2 * Wp2               # conv2 matmul M (full padded-width rows)
    RA2 = _round_up(A_OFF + NFULL2 + Wp2 + 2, 8)   # padded-buffer rows (shift-safe)
    return dict(PH1=PH1, PW1=PW1, NR1=NR1, NC1=NC1, N1=NR1 * NC1,
                PH2=PH2, PW2=PW2, NROW2=NROW2, Wp2=Wp2, A_OFF=A_OFF,
                NFULL2=NFULL2, RA2=RA2)


# ------------------------------ fused kernel --------------------------------

def _make_kernel(g, BB):
    PH1, PW1, NC1, N1 = g["PH1"], g["PW1"], g["NC1"], g["N1"]
    PH2, PW2, NROW2 = g["PH2"], g["PW2"], g["NROW2"]
    Wp2, A_OFF, NFULL2 = g["Wp2"], g["A_OFF"], g["NFULL2"]
    inv_gap = 1.0 / float(PH2 * PW2)

    def pool2x2(y_flat, PH, PW, Wrow, scr_ref):
        """2x2 floor max-pool of a row-major (2*PH, Wrow) map (cols >= 2*PW are
        ignored).  y_flat: (2*PH*Wrow, C) value.  Returns (PH*PW, C)."""
        C = y_flat.shape[-1]
        yr = y_flat.reshape(PH, 2, Wrow, C)
        v = jnp.maximum(yr[:, 0, :2 * PW, :], yr[:, 1, :2 * PW, :])   # vertical
        scr_ref[...] = v.reshape(PH * 2 * PW, C)
        # adjacent columns == adjacent flat rows (2*PW is even): two strided loads
        return jnp.maximum(scr_ref[pl.ds(0, PH * PW, 2), :],
                           scr_ref[pl.ds(1, PH * PW, 2), :])

    def kernel(x_ref, w1_ref, b1_ref, w2_ref, b2_ref, o_ref,
               p1_scr, a2_scr, p2_scr):
        # ---- conv1: ONE K=12 bf16 matmul for the whole BB-image block ----
        x = x_ref[...].reshape(BB * N1, 4 * CIN)
        y1_all = jnp.dot(x, w1_ref[...], preferred_element_type=jnp.float32)
        y1_all = jnp.maximum(y1_all + b1_ref[...], 0.0)            # (BB*N1, C1)

        # zero the padded conv2-input buffer (the pad border must be 0 each step;
        # the interior is fully rewritten below).  ~20 KB bf16, trivial vst cost.
        a2_scr[...] = jnp.zeros(a2_scr.shape, a2_scr.dtype)

        for bb in range(BB):
            # ---- maxpool 1 (dropout = identity at inference) ----
            # TODO(synk): nn.Dropout(0.3) training-mode masking not implemented.
            y1 = y1_all[bb * N1:(bb + 1) * N1]                     # (N1, C1)
            p1 = pool2x2(y1, PH1, PW1, NC1, p1_scr)                # (PH1*PW1, C1)
            p1 = p1.astype(jnp.bfloat16)                           # single cast

            # scatter pooled rows into the zero-padded width-flattened conv2
            # input (interior only; aligned 8-row stores thanks to A_OFF).
            for r in range(PH1):
                dst = A_OFF + (r + 1) * Wp2 + 1
                a2_scr[pl.ds(dst, PW1), :] = p1[r * PW1:(r + 1) * PW1]

            # ---- conv2: lane-concatenated im2col slab -> ONE K=256 bf16 matmul
            lhs = jnp.concatenate(
                [a2_scr[pl.ds(A_OFF + kh * Wp2 + kw, NFULL2), :]
                 for (kh, kw) in _SHIFTS], axis=1)                 # (NFULL2, 4*C1)
            y2 = jnp.dot(lhs, w2_ref[...], preferred_element_type=jnp.float32)
            y2 = jnp.maximum(y2 + b2_ref[...], 0.0)                # (NFULL2, C2)
            # (columns >= 2*PW2 of each Wp2-wide row are wrap/pad garbage; the
            #  pool below never reads them.)

            # ---- maxpool 2 + global average pool ----
            p2 = pool2x2(y2, PH2, PW2, Wp2, p2_scr)                # (PH2*PW2, C2)
            gap = jnp.sum(p2, axis=0, keepdims=True) * inv_gap     # (1, C2)
            o_ref[pl.ds(bb, 1)] = gap.reshape(1, 1, C2)

    return kernel


# ------------------------------ wrapper --------------------------------------

def _pick_bb(B):
    """Images per grid step; keep >=2 grid steps so both v7x cores are fed."""
    for bb in (8, 4, 2):
        if B % bb == 0 and B // bb >= 2:
            return bb
    return 1


@jax.jit
def siamese_forward(params, x_nchw):
    """Forward matching SiameseNetwork.forward (inference). (B,3,H,W)->(B,48)."""
    B, Cin, H, W = x_nchw.shape
    assert Cin == CIN, "SiameseNetwork expects 3 input channels"
    g = _geometry(H, W)
    BB = _pick_bb(B)
    kernel = _make_kernel(g, BB)
    NR1, NC1, N1 = g["NR1"], g["NC1"], g["N1"]

    # XLA glue: NCHW -> NHWC, conv1 im2col (k=2, pad=1) over the pooled region,
    # bf16 operands for the MXU.
    xh = jnp.transpose(x_nchw, (0, 2, 3, 1)).astype(jnp.float32)
    xp = jnp.pad(xh, ((0, 0), (1, 1), (1, 1), (0, 0)))
    patches = jnp.concatenate(
        [xp[:, kh:kh + NR1, kw:kw + NC1, :] for (kh, kw) in _SHIFTS], axis=-1)
    x_cols = patches.reshape(B, N1, 4 * CIN).astype(jnp.bfloat16)

    # weights: PyTorch (Cout, Cin, 2, 2) -> (kh*kw*Cin, Cout), bf16 for the MXU
    w1 = jnp.transpose(params["conv1_w"], (2, 3, 1, 0)).reshape(4 * CIN, C1)
    w1 = w1.astype(jnp.bfloat16)
    b1 = params["conv1_b"].reshape(1, C1).astype(jnp.float32)
    w2 = jnp.transpose(params["conv2_w"], (2, 3, 1, 0)).reshape(4 * C1, C2)
    w2 = w2.astype(jnp.bfloat16)
    b2 = params["conv2_b"].reshape(1, C2).astype(jnp.float32)

    grid_spec = pltpu.PrefetchScalarGridSpec(
        num_scalar_prefetch=0,
        grid=(B // BB,),
        in_specs=[
            pl.BlockSpec((BB, N1, 4 * CIN), lambda b: (b, 0, 0)),   # per-step images
            pl.BlockSpec(w1.shape, lambda b: (0, 0)),               # resident weights
            pl.BlockSpec(b1.shape, lambda b: (0, 0)),
            pl.BlockSpec(w2.shape, lambda b: (0, 0)),
            pl.BlockSpec(b2.shape, lambda b: (0, 0)),
        ],
        out_specs=pl.BlockSpec((BB, 1, C2), lambda b: (b, 0, 0)),
        scratch_shapes=[
            pltpu.VMEM((g["PH1"] * g["NC1"], C1), jnp.float32),      # pool1 rows
            pltpu.VMEM((g["RA2"], C1), jnp.bfloat16),                # padded conv2 in
            pltpu.VMEM((g["PH2"] * 2 * g["PW2"], C2), jnp.float32),  # pool2 rows
        ],
    )
    gap = pl.pallas_call(
        kernel,
        out_shape=jax.ShapeDtypeStruct((B, 1, C2), jnp.float32),
        grid_spec=grid_spec,
        compiler_params=pltpu.CompilerParams(dimension_semantics=("parallel",)),
    )(x_cols, w1, b1, w2, b2)

    # fc hoisted out of the kernel: one well-shaped batched matmul in XLA.
    gap = gap.reshape(B, C2)
    return gap @ params["fc_w"].T.astype(jnp.float32) + params["fc_b"].astype(jnp.float32)


# ------------------------------ reference & params ---------------------------

def _maxpool_nchw(x):
    B, C, H, W = x.shape
    H2, W2 = H // 2, W // 2
    x = x[:, :, :H2 * 2, :W2 * 2].reshape(B, C, H2, 2, W2, 2)
    return x.max(axis=(3, 5))


def _reference_forward(params, x):
    """Pure-JAX f32 reference of the PyTorch forward (inference)."""
    y = jax.lax.conv_general_dilated(
        x, params["conv1_w"], (1, 1), ((1, 1), (1, 1)),
        dimension_numbers=("NCHW", "OIHW", "NCHW"))
    y = jnp.maximum(y + params["conv1_b"][None, :, None, None], 0.0)
    y = _maxpool_nchw(y)
    y = jax.lax.conv_general_dilated(
        y, params["conv2_w"], (1, 1), ((1, 1), (1, 1)),
        dimension_numbers=("NCHW", "OIHW", "NCHW"))
    y = jnp.maximum(y + params["conv2_b"][None, :, None, None], 0.0)
    y = _maxpool_nchw(y)
    gap = jnp.mean(y, axis=(2, 3))                      # (B, 64)
    return gap @ params["fc_w"].T + params["fc_b"]      # (B, 48)


def init_params(key):
    """Deterministic synthetic parameters with the module's shapes."""
    k1, k2, k3, k4, k5, k6 = jax.random.split(key, 6)
    return {
        "conv1_w": jax.random.normal(k1, (64, 3, 2, 2), jnp.float32) * 0.1,
        "conv1_b": jax.random.normal(k2, (64,), jnp.float32) * 0.1,
        "conv2_w": jax.random.normal(k3, (64, 64, 2, 2), jnp.float32) * 0.05,
        "conv2_b": jax.random.normal(k4, (64,), jnp.float32) * 0.1,
        "fc_w":    jax.random.normal(k5, (EMBEDDING_DIM, 64), jnp.float32) * 0.1,
        "fc_b":    jax.random.normal(k6, (EMBEDDING_DIM,), jnp.float32) * 0.1,
    }


# --------------------------------- main ---------------------------------------

if __name__ == "__main__":
    key = jax.random.PRNGKey(0)
    pkey, xkey = jax.random.split(key)
    params = init_params(pkey)

    # Small input consistent with the module: NCHW, 3 input channels.
    x = jax.random.normal(xkey, (2, 3, 16, 16), jnp.float32)

    out = jax.block_until_ready(siamese_forward(params, x))
    assert out.shape == (2, EMBEDDING_DIM), out.shape
    assert out.dtype == jnp.float32

    ref = jax.block_until_ready(_reference_forward(params, x))
    max_err = float(jnp.max(jnp.abs(out - ref)))
    # bf16 conv operands give O(1e-3) abs error on O(0.1-0.3) outputs.
    assert max_err < 5e-2, f"max abs error vs reference: {max_err}"

    print("KERNEL_OK")
</pallas_src>

<mosaic_0001>
module attributes {stable_mosaic.version = 11 : i64} {
  func.func @kernel(%arg0: i32, %arg1: memref<1x256x12xbf16, #tpu.memory_space<vmem>>, %arg2: memref<12x64xbf16, #tpu.memory_space<vmem>>, %arg3: memref<1x64xf32, #tpu.memory_space<vmem>>, %arg4: memref<256x64xbf16, #tpu.memory_space<vmem>>, %arg5: memref<1x64xf32, #tpu.memory_space<vmem>>, %arg6: memref<1x1x64xf32, #tpu.memory_space<vmem>>, %arg7: memref<128x64xf32, #tpu.memory_space<vmem>>, %arg8: memref<160x64xbf16, #tpu.memory_space<vmem>>, %arg9: memref<32x64xf32, #tpu.memory_space<vmem>>) attributes {dimension_semantics = [#tpu.dimension_semantics<parallel>], iteration_bounds = array<i64: 2>, scalar_prefetch = 0 : i64, scratch_operands = 3 : i64, tpu.core_type = #tpu.core_type<tc>, window_params = [{transform_indices = @transform_0, window_bounds = array<i64: 1, 256, 12>}, {pipeline_mode = #tpu.pipeline_mode<synchronous>, transform_indices = @transform_1, window_bounds = array<i64: 12, 64>}, {pipeline_mode = #tpu.pipeline_mode<synchronous>, transform_indices = @transform_2, window_bounds = array<i64: 1, 64>}, {pipeline_mode = #tpu.pipeline_mode<synchronous>, transform_indices = @transform_3, window_bounds = array<i64: 256, 64>}, {pipeline_mode = #tpu.pipeline_mode<synchronous>, transform_indices = @transform_4, window_bounds = array<i64: 1, 64>}, {transform_indices = @transform_5, window_bounds = array<i64: 1, 1, 64>}]} {
    %c0 = arith.constant 0 : index
    %c0_0 = arith.constant 0 : index
    %c0_1 = arith.constant 0 : index
    %0 = vector.load %arg1[%c0, %c0_0, %c0_1] : memref<1x256x12xbf16, #tpu.memory_space<vmem>>, vector<1x256x12xbf16>
    %1 = vector.shape_cast %0 : vector<1x256x12xbf16> to vector<256x12xbf16>
    %c0_2 = arith.constant 0 : index
    %c0_3 = arith.constant 0 : index
    %2 = vector.load %arg2[%c0_2, %c0_3] : memref<12x64xbf16, #tpu.memory_space<vmem>>, vector<12x64xbf16>
    %cst = arith.constant dense<0.000000e+00> : vector<256x64xf32>
    %3 = tpu.matmul %1, %2, %cst {dimension_numbers = #tpu.dot_dimension_numbers<[1], [0], [0], [1], [0, 0, 1, 1], [], []>} : vector<256x12xbf16>, vector<12x64xbf16>, vector<256x64xf32> -> vector<256x64xf32>
    %c0_4 = arith.constant 0 : index
    %c0_5 = arith.constant 0 : index
    %4 = vector.load %arg3[%c0_4, %c0_5] : memref<1x64xf32, #tpu.memory_space<vmem>>, vector<1x64xf32>
    %5 = vector.broadcast %4 : vector<1x64xf32> to vector<256x64xf32>
    %6 = arith.addf %3, %5 : vector<256x64xf32>
    %cst_6 = arith.constant 0.000000e+00 : f32
    %7 = vector.broadcast %cst_6 : f32 to vector<256x64xf32>
    %8 = arith.maximumf %6, %7 : vector<256x64xf32>
    %cst_7 = arith.constant 0.000000e+00 : bf16
    %9 = vector.broadcast %cst_7 : bf16 to vector<160x64xbf16>
    %c0_8 = arith.constant 0 : index
    %c0_9 = arith.constant 0 : index
    %10 = vector.load %arg8[%c0_8, %c0_9] : memref<160x64xbf16, #tpu.memory_space<vmem>>, vector<160x64xbf16>
    tpu.vector_store %arg8[%c0_8, %c0_9], %9 {strides = array<i32>} : memref<160x64xbf16, #tpu.memory_space<vmem>>, vector<160x64xbf16>,
    %11 = vector.shape_cast %8 : vector<256x64xf32> to vector<8x2x16x64xf32>
    %12 = vector.extract_strided_slice %11 {offsets = [0, 0, 0, 0], sizes = [8, 1, 16, 64], strides = [1, 1, 1, 1]} : vector<8x2x16x64xf32> to vector<8x1x16x64xf32>
    %13 = vector.shape_cast %12 : vector<8x1x16x64xf32> to vector<8x16x64xf32>
    %14 = vector.extract_strided_slice %11 {offsets = [0, 1, 0, 0], sizes = [8, 1, 16, 64], strides = [1, 1, 1, 1]} : vector<8x2x16x64xf32> to vector<8x1x16x64xf32>
    %15 = vector.shape_cast %14 : vector<8x1x16x64xf32> to vector<8x16x64xf32>
    %16 = arith.maximumf %13, %15 : vector<8x16x64xf32>
    %17 = vector.shape_cast %16 : vector<8x16x64xf32> to vector<128x64xf32>
    %c0_10 = arith.constant 0 : index
    %c0_11 = arith.constant 0 : index
    %18 = vector.load %arg7[%c0_10, %c0_11] : memref<128x64xf32, #tpu.memory_space<vmem>>, vector<128x64xf32>
    tpu.vector_store %arg7[%c0_10, %c0_11], %17 {strides = array<i32>} : memref<128x64xf32, #tpu.memory_space<vmem>>, vector<128x64xf32>,
    %c0_12 = arith.constant 0 : index
    %c0_13 = arith.constant 0 : index
    %19 = tpu.strided_load %arg7[%c0_12, %c0_13] {strides = array<i32: 2, 1>} : memref<128x64xf32, #tpu.memory_space<vmem>>, vector<64x64xf32>
    %c1 = arith.constant 1 : index
    %c0_14 = arith.constant 0 : index
    %20 = tpu.strided_load %arg7[%c1, %c0_14] {strides = array<i32: 2, 1>} : memref<128x64xf32, #tpu.memory_space<vmem>>, vector<64x64xf32>
    %21 = arith.maximumf %19, %20 : vector<64x64xf32>
    %22 = arith.truncf %21 : vector<64x64xf32> to vector<64x64xbf16>
    %23 = vector.extract_strided_slice %22 {offsets = [0, 0], sizes = [8, 64], strides = [1, 1]} : vector<64x64xbf16> to vector<8x64xbf16>
    %c24 = arith.constant 24 : index
    %c0_15 = arith.constant 0 : index
    %24 = vector.load %arg8[%c24, %c0_15] : memref<160x64xbf16, #tpu.memory_space<vmem>>, vector<8x64xbf16>
    tpu.vector_store %arg8[%c24, %c0_15], %23 {strides = array<i32>} : memref<160x64xbf16, #tpu.memory_space<vmem>>, vector<8x64xbf16>,
    %25 = vector.extract_strided_slice %22 {offsets = [8, 0], sizes = [8, 64], strides = [1, 1]} : vector<64x64xbf16> to vector<8x64xbf16>
    %c40 = arith.constant 40 : index
    %c0_16 = arith.constant 0 : index
    %26 = vector.load %arg8[%c40, %c0_16] : memref<160x64xbf16, #tpu.memory_space<vmem>>, vector<8x64xbf16>
    tpu.vector_store %arg8[%c40, %c0_16], %25 {strides = array<i32>} : memref<160x64xbf16, #tpu.memory_space<vmem>>, vector<8x64xbf16>,
    %27 = vector.extract_strided_slice %22 {offsets = [16, 0], sizes = [8, 64], strides = [1, 1]} : vector<64x64xbf16> to vector<8x64xbf16>
    %c56 = arith.constant 56 : index
    %c0_17 = arith.constant 0 : index
    %28 = vector.load %arg8[%c56, %c0_17] : memref<160x64xbf16, #tpu.memory_space<vmem>>, vector<8x64xbf16>
    tpu.vector_store %arg8[%c56, %c0_17], %27 {strides = array<i32>} : memref<160x64xbf16, #tpu.memory_space<vmem>>, vector<8x64xbf16>,
    %29 = vector.extract_strided_slice %22 {offsets = [24, 0], sizes = [8, 64], strides = [1, 1]} : vector<64x64xbf16> to vector<8x64xbf16>
    %c72 = arith.constant 72 : index
    %c0_18 = arith.constant 0 : index
    %30 = vector.load %arg8[%c72, %c0_18] : memref<160x64xbf16, #tpu.memory_space<vmem>>, vector<8x64xbf16>
    tpu.vector_store %arg8[%c72, %c0_18], %29 {strides = array<i32>} : memref<160x64xbf16, #tpu.memory_space<vmem>>, vector<8x64xbf16>,
    %31 = vector.extract_strided_slice %22 {offsets = [32, 0], sizes = [8, 64], strides = [1, 1]} : vector<64x64xbf16> to vector<8x64xbf16>
    %c88 = arith.constant 88 : index
    %c0_19 = arith.constant 0 : index
    %32 = vector.load %arg8[%c88, %c0_19] : memref<160x64xbf16, #tpu.memory_space<vmem>>, vector<8x64xbf16>
    tpu.vector_store %arg8[%c88, %c0_19], %31 {strides = array<i32>} : memref<160x64xbf16, #tpu.memory_space<vmem>>, vector<8x64xbf16>,
    %33 = vector.extract_strided_slice %22 {offsets = [40, 0], sizes = [8, 64], strides = [1, 1]} : vector<64x64xbf16> to vector<8x64xbf16>
    %c104 = arith.constant 104 : index
    %c0_20 = arith.constant 0 : index
    %34 = vector.load %arg8[%c104, %c0_20] : memref<160x64xbf16, #tpu.memory_space<vmem>>, vector<8x64xbf16>
    tpu.vector_store %arg8[%c104, %c0_20], %33 {strides = array<i32>} : memref<160x64xbf16, #tpu.memory_space<vmem>>, vector<8x64xbf16>,
    %35 = vector.extract_strided_slice %22 {offsets = [48, 0], sizes = [8, 64], strides = [1, 1]} : vector<64x64xbf16> to vector<8x64xbf16>
    %c120 = arith.constant 120 : index
    %c0_21 = arith.constant 0 : index
    %36 = vector.load %arg8[%c120, %c0_21] : memref<160x64xbf16, #tpu.memory_space<vmem>>, vector<8x64xbf16>
    tpu.vector_store %arg8[%c120, %c0_21], %35 {strides = array<i32>} : memref<160x64xbf16, #tpu.memory_space<vmem>>, vector<8x64xbf16>,
    %37 = vector.extract_strided_slice %22 {offsets = [56, 0], sizes = [8, 64], strides = [1, 1]} : vector<64x64xbf16> to vector<8x64xbf16>
    %c136 = arith.constant 136 : index
    %c0_22 = arith.constant 0 : index
    %38 = vector.load %arg8[%c136, %c0_22] : memref<160x64xbf16, #tpu.memory_space<vmem>>, vector<8x64xbf16>
    tpu.vector_store %arg8[%c136, %c0_22], %37 {strides = array<i32>} : memref<160x64xbf16, #tpu.memory_space<vmem>>, vector<8x64xbf16>,
    %c7 = arith.constant 7 : index
    %c0_23 = arith.constant 0 : index
    %39 = vector.load %arg8[%c7, %c0_23] : memref<160x64xbf16, #tpu.memory_space<vmem>>, vector<128x64xbf16>
    %c8 = arith.constant 8 : index
    %c0_24 = arith.constant 0 : index
    %40 = vector.load %arg8[%c8, %c0_24] : memref<160x64xbf16, #tpu.memory_space<vmem>>, vector<128x64xbf16>
    %c23 = arith.constant 23 : index
    %c0_25 = arith.constant 0 : index
    %41 = vector.load %arg8[%c23, %c0_25] : memref<160x64xbf16, #tpu.memory_space<vmem>>, vector<128x64xbf16>
    %c24_26 = arith.constant 24 : index
    %c0_27 = arith.constant 0 : index
    %42 = vector.load %arg8[%c24_26, %c0_27] : memref<160x64xbf16, #tpu.memory_space<vmem>>, vector<128x64xbf16>
    %43 = tpu.concatenate %39, %40, %41, %42 in 1 : vector<128x64xbf16>, vector<128x64xbf16>, vector<128x64xbf16>, vector<128x64xbf16> -> vector<128x256xbf16>
    %c0_28 = arith.constant 0 : index
    %c0_29 = arith.constant 0 : index
    %44 = vector.load %arg4[%c0_28, %c0_29] : memref<256x64xbf16, #tpu.memory_space<vmem>>, vector<256x64xbf16>
    %cst_30 = arith.constant dense<0.000000e+00> : vector<128x64xf32>
    %45 = tpu.matmul %43, %44, %cst_30 {dimension_numbers = #tpu.dot_dimension_numbers<[1], [0], [0], [1], [0, 0, 1, 1], [], []>} : vector<128x256xbf16>, vector<256x64xbf16>, vector<128x64xf32> -> vector<128x64xf32>
    %c0_31 = arith.constant 0 : index
    %c0_32 = arith.constant 0 : index
    %46 = vector.load %arg5[%c0_31, %c0_32] : memref<1x64xf32, #tpu.memory_space<vmem>>, vector<1x64xf32>
    %47 = vector.broadcast %46 : vector<1x64xf32> to vector<128x64xf32>
    %48 = arith.addf %45, %47 : vector<128x64xf32>
    %cst_33 = arith.constant 0.000000e+00 : f32
    %49 = vector.broadcast %cst_33 : f32 to vector<128x64xf32>
    %50 = arith.maximumf %48, %49 : vector<128x64xf32>
    %51 = vector.shape_cast %50 : vector<128x64xf32> to vector<4x2x16x64xf32>
    %52 = vector.extract_strided_slice %51 {offsets = [0, 0, 0, 0], sizes = [4, 1, 8, 64], strides = [1, 1, 1, 1]} : vector<4x2x16x64xf32> to vector<4x1x8x64xf32>
    %53 = vector.shape_cast %52 : vector<4x1x8x64xf32> to vector<4x8x64xf32>
    %54 = vector.extract_strided_slice %51 {offsets = [0, 1, 0, 0], sizes = [4, 1, 8, 64], strides = [1, 1, 1, 1]} : vector<4x2x16x64xf32> to vector<4x1x8x64xf32>
    %55 = vector.shape_cast %54 : vector<4x1x8x64xf32> to vector<4x8x64xf32>
    %56 = arith.maximumf %53, %55 : vector<4x8x64xf32>
    %57 = vector.shape_cast %56 : vector<4x8x64xf32> to vector<32x64xf32>
    %c0_34 = arith.constant 0 : index
    %c0_35 = arith.constant 0 : index
    %58 = vector.load %arg9[%c0_34, %c0_35] : memref<32x64xf32, #tpu.memory_space<vmem>>, vector<32x64xf32>
    tpu.vector_store %arg9[%c0_34, %c0_35], %57 {strides = array<i32>} : memref<32x64xf32, #tpu.memory_space<vmem>>, vector<32x64xf32>,
    %c0_36 = arith.constant 0 : index
    %c0_37 = arith.constant 0 : index
    %59 = tpu.strided_load %arg9[%c0_36, %c0_37] {strides = array<i32: 2, 1>} : memref<32x64xf32, #tpu.memory_space<vmem>>, vector<16x64xf32>
    %c1_38 = arith.constant 1 : index
    %c0_39 = arith.constant 0 : index
    %60 = tpu.strided_load %arg9[%c1_38, %c0_39] {strides = array<i32: 2, 1>} : memref<32x64xf32, #tpu.memory_space<vmem>>, vector<16x64xf32>
    %61 = arith.maximumf %59, %60 : vector<16x64xf32>
    %cst_40 = arith.constant dense<0.000000e+00> : vector<64xf32>
    %62 = vector.multi_reduction <add>, %61, %cst_40 [0] : vector<16x64xf32> to vector<64xf32>
    %63 = vector.shape_cast %62 : vector<64xf32> to vector<1x64xf32>
    %cst_41 = arith.constant 6.250000e-02 : f32
    %64 = vector.broadcast %cst_41 : f32 to vector<1x64xf32>
    %65 = arith.mulf %63, %64 : vector<1x64xf32>
    %66 = vector.shape_cast %65 : vector<1x64xf32> to vector<1x1x64xf32>
    %c0_42 = arith.constant 0 : index
    %c0_43 = arith.constant 0 : index
    %c0_44 = arith.constant 0 : index
    %67 = vector.load %arg6[%c0_42, %c0_43, %c0_44] : memref<1x1x64xf32, #tpu.memory_space<vmem>>, vector<1x1x64xf32>
    tpu.vector_store %arg6[%c0_42, %c0_43, %c0_44], %66 {strides = array<i32>} : memref<1x1x64xf32, #tpu.memory_space<vmem>>, vector<1x1x64xf32>,
    return
  }
  func.func @transform_0(%arg0: i32) -> (i32, i32, i32) {
    %c0_i32 = arith.constant 0 : i32
    %c0_i32_0 = arith.constant 0 : i32
    %c0_i32_1 = arith.constant 0 : i32
    return %arg0, %c0_i32, %c0_i32_0 : i32, i32, i32
  }
  func.func @transform_1(%arg0: i32) -> (i32, i32) {
    %c0_i32 = arith.constant 0 : i32
    %c0_i32_0 = arith.constant 0 : i32
    %c0_i32_1 = arith.constant 0 : i32
    return %c0_i32, %c0_i32_0 : i32, i32
  }
  func.func @transform_2(%arg0: i32) -> (i32, i32) {
    %c0_i32 = arith.constant 0 : i32
    %c0_i32_0 = arith.constant 0 : i32
    %c0_i32_1 = arith.constant 0 : i32
    return %c0_i32, %c0_i32_0 : i32, i32
  }
  func.func @transform_3(%arg0: i32) -> (i32, i32) {
    %c0_i32 = arith.constant 0 : i32
    %c0_i32_0 = arith.constant 0 : i32
    %c0_i32_1 = arith.constant 0 : i32
    return %c0_i32, %c0_i32_0 : i32, i32
  }
  func.func @transform_4(%arg0: i32) -> (i32, i32) {
    %c0_i32 = arith.constant 0 : i32
    %c0_i32_0 = arith.constant 0 : i32
    %c0_i32_1 = arith.constant 0 : i32
    return %c0_i32, %c0_i32_0 : i32, i32
  }
  func.func @transform_5(%arg0: i32) -> (i32, i32, i32) {
    %c0_i32 = arith.constant 0 : i32
    %c0_i32_0 = arith.constant 0 : i32
    %c0_i32_1 = arith.constant 0 : i32
    return %arg0, %c0_i32, %c0_i32_0 : i32, i32, i32
  }
}

</mosaic_0001>

<bundles_post_ra>
// kernel: siamese_forward.1
= control target key start
LH: loop header
LB: loop body
LE: loop exit
PB: predicated region body
PF: predicated region fallthrough
CT: control target
= control target key end

     0   :  { %s1574_s18 = smov 0   ;;  %s1864_s0 = inlined_call_operand.vmem [shape: bf16[2,256,12], index: 0, kind: input, shape index: {}]   ;;  %s1865_s1 = inlined_call_operand.vmem [shape: bf16[12,64], index: 1, kind: input, shape index: {}]   ;;  %s1866_s2 = inlined_call_operand.vmem [shape: f32[1,64], index: 2, kind: input, shape index: {}]   ;;  %s1867_s3 = inlined_call_operand.vmem [shape: bf16[256,64], index: 3, kind: input, shape index: {}]   ;;  %s1868_s4 = inlined_call_operand.vmem [shape: f32[1,64], index: 4, kind: input, shape index: {}]   ;;  %s1869_s5 = inlined_call_operand.vmem [shape: f32[2,1,64], index: 5, kind: output, shape index: {}]  }
   0x1 LB: > { %s1255_s19 = sadd.s32 4294967295, %s1540_s18   ;;  %p1259_p0 = scmp.ge.s32.totalorder %s1540_s18, 1  ;;  %s1540_s18 = sphi %s1574_s18, %s15_s18  }
   0x2   : > { %p187_p1 = scmp.lt.s32.totalorder %s1540_s18, 3 }
   0x4   : > { %p188_p2 = pnand %p1259_p0, %p187_p1 }
   0x5   : > { %p213_p3 = scmp.lt.s32.totalorder (!%p188_p2), %s1255_s19, 1  ;;  %s1543_s30 = smov (!%p188_p2), 64  }
   0x6   : > { %191 = sbr.rel (%p188_p2) target bundleno = 666 (0x29a), region = 40 }
   0xb   : > { %v1328_v0 = vld [vmem:[%s1865_s1] sm:$0xf]  ;;  %v1429_v1 = vld [vmem:[%s1865_s1] sm:$0x30]  ;;  %vm394_vm0 = vcmask 1045504   ;;  %s1871_s19 = smov (!%p213_p3, %s1255_s19), 1 }
   0xc   : > { %v1329_v2 = vor.u32 %v1429_v1, %v1328_v0  ;;  %s1412_s24 = sshll.u32 %s1871_s19, 7  ;;  %vm345_vm1 = vcmask 97280   ;;  %vm519_vm2 = vcmask 519168   ;;  %v1542_v23 = vmov 0   ;;  %v1634_v24 = vld [vmem:[%s1866_s2] ss:$0 sm:$0xff]  ;;  %s220_s21 = scalar_lea.vmem %s1869_s5, %s1871_s19 }
   0xd   : > { %s1594_s27 = scalar_lea.vmem %s1864_s0, %s1412_s24  ;;  %533 = vst.msk [vmem:[#allocation3 + $0x34] sm:$0xf] %vm519_vm2, %v1542_v23  ;;  %vm556_vm3 = vcmask 523264   ;;  %vm699_vm4 = vsmask.f32 3328  ;;  %vm1206_vm6 = vcmask 516096  }
   0xe   : > { %v396_v3 = vsel %vm394_vm0, %v1329_v2, 0  ;;  %v1413_v4 = vld [vmem:[%s1594_s27] sm:$0xff]  ;;  %v1422_v5 = vld [vmem:[%s1594_s27 + $0x48] sm:$0xff]  ;;  %v1423_v7 = vld [vmem:[%s1594_s27 + $0x50] sm:$0xff]  ;;  %520 = vst.msk [vmem:[#allocation3] sm:$0xf] %vm519_vm2, %v1542_v23 }
   0xf   : > { %405 = vmatpush.bf16.msra.mxu0 %v396_v3  ;;  %1521 = vmatpush.bf16.msra.mxu3 %v396_v3  ;;  %v1414_v6 = vld [vmem:[%s1594_s27 + $0x8] sm:$0xff]  ;;  %v1415_v8 = vld [vmem:[%s1594_s27 + $0x10] sm:$0xff]  ;;  %v1424_v9 = vld [vmem:[%s1594_s27 + $0x58] sm:$0xff]  ;;  %521 = vst.msk [vmem:[#allocation3 + $0x4] sm:$0xf] %vm519_vm2, %v1542_v23 }
  0x10   : > { %v1416_v10 = vld [vmem:[%s1594_s27 + $0x18] sm:$0xff]  ;;  %v1425_v11 = vld [vmem:[%s1594_s27 + $0x60] sm:$0xff]  ;;  %v1426_v13 = vld [vmem:[%s1594_s27 + $0x68] sm:$0xff]  ;;  %522 = vst.msk [vmem:[#allocation3 + $0x8] sm:$0xf] %vm519_vm2, %v1542_v23 }
  0x11   : > { %v1417_v12 = vld [vmem:[%s1594_s27 + $0x20] sm:$0xff]  ;;  %v1418_v14 = vld [vmem:[%s1594_s27 + $0x28] sm:$0xff]  ;;  %v1427_v15 = vld [vmem:[%s1594_s27 + $0x70] sm:$0xff]  ;;  %523 = vst.msk [vmem:[#allocation3 + $0xc] sm:$0xf] %vm519_vm2, %v1542_v23 }
  0x12   : > { %1330 = vmatmul.msk.bf16.vlgmr.msra.gmra.mxu0 %vm345_vm1, %v1413_v4  ;;  %1339 = vmatmul.msk.bf16.vlgmr.msra.gmra.mxu3 %vm345_vm1, %v1422_v5  ;;  %v1419_v16 = vld [vmem:[%s1594_s27 + $0x30] sm:$0xff]  ;;  %v1428_v17 = vld [vmem:[%s1594_s27 + $0x78] sm:$0xff]  ;;  %v1421_v19 = vld [vmem:[%s1594_s27 + $0x40] sm:$0xff]  ;;  %524 = vst.msk [vmem:[#allocation3 + $0x10] sm:$0xf] %vm519_vm2, %v1542_v23 }
  0x13   : > { %v1420_v18 = vld [vmem:[%s1594_s27 + $0x38] sm:$0xff]  ;;  %525 = vst.msk [vmem:[#allocation3 + $0x14] sm:$0xf] %vm519_vm2, %v1542_v23  ;;  %vm886_vm5 = vsmask.f32 4352 }
  0x14   : > { %526 = vst.msk [vmem:[#allocation3 + $0x18] sm:$0xf] %vm519_vm2, %v1542_v23 }
  0x15   : > { %527 = vst.msk [vmem:[#allocation3 + $0x1c] sm:$0xf] %vm519_vm2, %v1542_v23 }
  0x16   : > { %528 = vst.msk [vmem:[#allocation3 + $0x20] sm:$0xf] %vm519_vm2, %v1542_v23  ;;  %v1667_v54 = vld [vmem:[#allocation3 + $0x4] sm:$0xf] }
  0x17   : > { %529 = vst.msk [vmem:[#allocation3 + $0x24] sm:$0xf] %vm519_vm2, %v1542_v23  ;;  %v666_v61 = vunpack.c.l.b16 %v1667_v54 }
  0x18   : > { %530 = vst.msk [vmem:[#allocation3 + $0x28] sm:$0xf] %vm519_vm2, %v1542_v23 }
  0x19   : > { %531 = vst.msk [vmem:[#allocation3 + $0x2c] sm:$0xf] %vm519_vm2, %v1542_v23 }
  0x1a   : > { %532 = vst.msk [vmem:[#allocation3 + $0x30] sm:$0xf] %vm519_vm2, %v1542_v23 }
  0x1b   : > { %534 = vst.msk [vmem:[#allocation3 + $0x38] sm:$0xf] %vm519_vm2, %v1542_v23 }
  0x1c   : > { %535 = vst.msk [vmem:[#allocation3 + $0x3c] sm:$0xf] %vm519_vm2, %v1542_v23 }
  0x1d   : > { %536 = vst.msk [vmem:[#allocation3 + $0x40] sm:$0xf] %vm519_vm2, %v1542_v23 }
  0x1e   : > { %537 = vst.msk [vmem:[#allocation3 + $0x44] sm:$0xf] %vm519_vm2, %v1542_v23 }
  0x1f   : > { %538 = vst.msk [vmem:[#allocation3 + $0x48] sm:$0xf] %vm519_vm2, %v1542_v23 }
  0x22   : > { %1331 = vmatmul.msk.bf16.gmra.mxu0 %vm345_vm1, %v1414_v6  ;;  %1340 = vmatmul.msk.bf16.gmra.mxu3 %vm345_vm1, %v1423_v7 }
  0x32   : > { %1332 = vmatmul.msk.bf16.gmra.mxu0 %vm345_vm1, %v1415_v8  ;;  %1341 = vmatmul.msk.bf16.gmra.mxu3 %vm345_vm1, %v1424_v9 }
  0x42   : > { %1333 = vmatmul.msk.bf16.gmra.mxu0 %vm345_vm1, %v1416_v10  ;;  %1342 = vmatmul.msk.bf16.gmra.mxu3 %vm345_vm1, %v1425_v11 }
  0x52   : > { %1334 = vmatmul.msk.bf16.gmra.mxu0 %vm345_vm1, %v1417_v12  ;;  %1343 = vmatmul.msk.bf16.gmra.mxu3 %vm345_vm1, %v1426_v13 }
  0x62   : > { %1335 = vmatmul.msk.bf16.gmra.mxu0 %vm345_vm1, %v1418_v14  ;;  %1344 = vmatmul.msk.bf16.gmra.mxu3 %vm345_vm1, %v1427_v15 }
  0x72   : > { %1336 = vmatmul.msk.bf16.gmra.mxu0 %vm345_vm1, %v1419_v16  ;;  %1345 = vmatmul.msk.bf16.gmra.mxu3 %vm345_vm1, %v1428_v17 }
  0x82   : > { %1337 = vmatmul.msk.bf16.gmra.mxu0 %vm345_vm1, %v1420_v18 }
  0x8f   : > { %v407_v20 = vpop.f32.mrf.mxu0 }
  0x90   : > { %v408_v26 = vadd.f32 %v1634_v24, %v407_v20 }
  0x92   : > { %1338 = vmatmul.msk.bf16.gmra.mxu0 %vm345_vm1, %v1421_v19  ;;  %v487_v29 = vmax.f32 %v408_v26, 0.0 }
  0x95   : > { %v1628_v21 = vpop.f32.mrf.mxu3 }
  0x97   : > { %v409_v22 = vpop.f32.mrf.mxu0 }
  0x98   : > { %v410_v33 = vadd.f32 %v1634_v24, %v409_v22 }
  0x9a   : > { %v488_v36 = vmax.f32 %v410_v33, 0.0 }
  0x9d   : > { %v1638_v25 = vpop.f32.mrf.mxu3 }
  0x9f   : > { %v412_v27 = vpop.f32.mrf.mxu0 }
  0xa0   : > { %v413_v28 = vadd.f32 %v1634_v24, %v412_v27 }
  0xa2   : > { %v489_v30 = vmax.f32 %v413_v28, 0.0 }
  0xa4   : > { %v540_v31 = vmax.f32 %v487_v29, %v489_v30 }
  0xa5   : > { %v457_v32 = vpop.f32.mrf.mxu3 }
  0xa6   : > { %557 = vst.msk [vmem:[#allocation2] sm:$0xff] %vm556_vm3, %v540_v31  ;;  %v458_v41 = vadd.f32 %v1634_v24, %v457_v32 }
  0xa7   : > { %v414_v34 = vpop.f32.mrf.mxu0 }
  0xa8   : > { %v415_v35 = vadd.f32 %v1634_v24, %v414_v34  ;;  %v507_v45 = vmax.f32 %v458_v41, 0.0 }
  0xaa   : > { %v490_v37 = vmax.f32 %v415_v35, 0.0 }
  0xac   : > { %v541_v38 = vmax.f32 %v488_v36, %v490_v37 }
  0xad   : > { %v459_v39 = vpop.f32.mrf.mxu3 }
  0xae   : > { %558 = vst.msk [vmem:[#allocation2 + $0x8] sm:$0xff] %vm556_vm3, %v541_v38  ;;  %v460_v51 = vadd.f32 %v1634_v24, %v459_v39 }
  0xaf   : > { %v417_v40 = vpop.f32.mrf.mxu0 }
  0xb0   : > { %v508_v55 = vmax.f32 %v460_v51, 0.0  ;;  %v418_v56 = vadd.f32 %v1634_v24, %v417_v40 }
  0xb2   : > { %v491_v63 = vmax.f32 %v418_v56, 0.0 }
  0xb5   : > { %v573_v42 = vld [vmem:[#allocation2] ss:$2 sm:$0xff]  ;;  %v589_v43 = vld [vmem:[#allocation2 + $0x1] ss:$2 sm:$0xff]  ;;  %v462_v44 = vpop.f32.mrf.mxu3 }
  0xb6   : > { %v604_v46 = vmax.f32 %v573_v42, %v589_v43  ;;  %v463_v47 = vadd.f32 %v1634_v24, %v462_v44 }
  0xb7   : > { %v419_v48 = vpop.f32.mrf.mxu0 }
  0xb8   : > { %v612_v49 = vpack.c.bf16 %v604_v46, %v604_v46  ;;  %v509_v50 = vmax.f32 %v463_v47, 0.0  ;;  %v420_v6 = vadd.f32 %v1634_v24, %v419_v48 }
  0xba   : > { %v550_v52 = vmax.f32 %v507_v45, %v509_v50  ;;  %620 = vst.msk [vmem:[#allocation3 + $0xc] sm:$0xf] %vm519_vm2, %v612_v49  ;;  %v492_v13 = vmax.f32 %v420_v6, 0.0 }
  0xbc   : > { %567 = vst.msk [vmem:[#allocation2 + $0x50] sm:$0xff] %vm556_vm3, %v550_v52 }
  0xbd   : > { %v464_v53 = vpop.f32.mrf.mxu3 }
  0xbe   : > { %v465_v57 = vadd.f32 %v1634_v24, %v464_v53 }
  0xbf   : > { %v422_v58 = vpop.f32.mrf.mxu0 }
  0xc0   : > { %v510_v59 = vmax.f32 %v465_v57, 0.0  ;;  %v423_v60 = vadd.f32 %v1634_v24, %v422_v58 }
  0xc1   : > { %v1673_v62 = vld [vmem:[#allocation3 + $0x8] sm:$0xff]  }
  0xc2   : > { %v551_v0 = vmax.f32 %v508_v55, %v510_v59  ;;  %v493_v1 = vmax.f32 %v423_v60, 0.0  ;;  %v1448_v2 = vunpack.c.l.b16 %v1673_v62  ;;  %v1449_v45 = vunpack.c.h.b16 %v1673_v62 }
  0xc4   : > { %568 = vst.msk [vmem:[#allocation2 + $0x58] sm:$0xff] %vm556_vm3, %v551_v0  ;;  %v542_v3 = vmax.f32 %v491_v63, %v493_v1  ;;  %v691_v4 = vpack.c.b16 %v1448_v2, %v666_v61 }
  0xc5   : > { %v467_v5 = vpop.f32.mrf.mxu3 }
  0xc6   : > { %559 = vst.msk [vmem:[#allocation2 + $0x10] sm:$0xff] %vm556_vm3, %v542_v3  ;;  %v701_v7 = vshrl.u32 %v691_v4, 16  ;;  %v704_v8 = vshll.u32 %v691_v4, 16  ;;  %v468_v26 = vadd.f32 %v1634_v24, %v467_v5 }
  0xc7   : > { %v424_v9 = vpop.f32.mrf.mxu0 }
  0xc8   : > { %v425_v10 = vadd.f32 %v1634_v24, %v424_v9  ;;  %v703_v11 = vrot.slane %v701_v7, 4  ;;  %v706_v12 = vrot.slane %v704_v8, 5  ;;  %v511_v30 = vmax.f32 %v468_v26, 0.0 }
  0xca   : > { %v494_v14 = vmax.f32 %v425_v10, 0.0  ;;  %v1682_v15 = vor.u32 %v706_v12, %v703_v11 }
  0xcb   : > { %v583_v16 = vld [vmem:[#allocation2 + $0x50] ss:$2 sm:$0xff]  ;;  %v599_v17 = vld [vmem:[#allocation2 + $0x51] ss:$2 sm:$0xff] }
  0xcc   : > { %v609_v18 = vmax.f32 %v583_v16, %v599_v17  ;;  %v543_v19 = vmax.f32 %v492_v13, %v494_v14  ;;  %771 = vrot.lane.b32.xlu1 %v1682_v15, %s1543_s30 }
  0xcd   : > { %v469_v20 = vpop.f32.mrf.mxu3 }
  0xce   : > { %v617_v22 = vpack.c.bf16 %v609_v18, %v609_v18  ;;  %560 = vst.msk [vmem:[#allocation2 + $0x18] sm:$0xff] %vm556_vm3, %v543_v19  ;;  %v470_v36 = vadd.f32 %v1634_v24, %v469_v20 }
  0xcf   : > { %v427_v23 = vpop.f32.mrf.mxu0 }
  0xd0   : > { %625 = vst.msk [vmem:[#allocation3 + $0x34] sm:$0xf] %vm519_vm2, %v617_v22  ;;  %v512_v39 = vmax.f32 %v470_v36, 0.0  ;;  %v428_v40 = vadd.f32 %v1634_v24, %v427_v23 }
  0xd2   : > { %v495_v48 = vmax.f32 %v428_v40, 0.0 }
  0xd5   : > { %v575_v27 = vld [vmem:[#allocation2 + $0x10] ss:$2 sm:$0xff]  ;;  %v591_v28 = vld [vmem:[#allocation2 + $0x11] ss:$2 sm:$0xff]  ;;  %v472_v29 = vpop.f32.mrf.mxu3 }
  0xd6   : > { %v605_v31 = vmax.f32 %v575_v27, %v591_v28  ;;  %v473_v32 = vadd.f32 %v1634_v24, %v472_v29 }
  0xd7   : > { %v429_v33 = vpop.f32.mrf.mxu0 }
  0xd8   : > { %v613_v34 = vpack.c.bf16 %v605_v31, %v605_v31  ;;  %v513_v35 = vmax.f32 %v473_v32, 0.0  ;;  %v430_v57 = vadd.f32 %v1634_v24, %v429_v33 }
  0xda   : > { %621 = vst.msk [vmem:[#allocation3 + $0x14] sm:$0xf] %vm519_vm2, %v613_v34  ;;  %v552_v37 = vmax.f32 %v511_v30, %v513_v35  ;;  %v496_v5 = vmax.f32 %v430_v57, 0.0 }
  0xdc   : > { %569 = vst.msk [vmem:[#allocation2 + $0x60] sm:$0xff] %vm556_vm3, %v552_v37 }
  0xdd   : > { %v474_v38 = vpop.f32.mrf.mxu3 }
  0xde   : > { %v475_v41 = vadd.f32 %v1634_v24, %v474_v38 }
  0xdf   : > { %v432_v42 = vpop.f32.mrf.mxu0 }
  0xe0   : > { %v514_v43 = vmax.f32 %v475_v41, 0.0  ;;  %v433_v44 = vadd.f32 %v1634_v24, %v432_v42 }
  0xe1   : > { %v1697_v46 = vld [vmem:[#allocation3 + $0x10] sm:$0xff]  }
  0xe2   : > { %v1513_v47 = vld [vmem:[#allocation3 + $0x14] sm:$0xff]   ;;  %v553_v49 = vmax.f32 %v512_v39, %v514_v43  ;;  %v497_v50 = vmax.f32 %v433_v44, 0.0  ;;  %v1452_v51 = vunpack.c.l.b16 %v1697_v46 }
  0xe3   : > { %v718_v52 = vshrl.u32 %v1513_v47, 16  ;;  %v721_v53 = vshll.u32 %v1513_v47, 16 }
  0xe4   : > { %570 = vst.msk [vmem:[#allocation2 + $0x68] sm:$0xff] %vm556_vm3, %v553_v49  ;;  %v544_v55 = vmax.f32 %v495_v48, %v497_v50  ;;  %v692_v56 = vpack.c.b16 %v1452_v51, %v1449_v45 }
  0xe5   : > { %v477_v58 = vpop.f32.mrf.mxu3  ;;  %v720_v63 = vrot.slane %v718_v52, 4  ;;  %v723_v0 = vrot.slane %v721_v53, 5 }
  0xe6   : > { %561 = vst.msk [vmem:[#allocation2 + $0x20] sm:$0xff] %vm556_vm3, %v544_v55  ;;  %v709_v59 = vshrl.u32 %v692_v56, 16  ;;  %v712_v60 = vshll.u32 %v692_v56, 16  ;;  %v478_v19 = vadd.f32 %v1634_v24, %v477_v58 }
  0xe7   : > { %v434_v1 = vpop.f32.mrf.mxu0  ;;  %v724_v8 = vor.u32 %v723_v0, %v720_v63 }
  0xe8   : > { %v435_v2 = vadd.f32 %v1634_v24, %v434_v1  ;;  %v711_v3 = vrot.slane %v709_v59, 4  ;;  %v714_v4 = vrot.slane %v712_v60, 5  ;;  %v515_v26 = vmax.f32 %v478_v19, 0.0 }
  0xe9   : > { %v453_v1 = vadd.f32 %v1634_v24, %v1628_v21 }
  0xea   : > { %v498_v6 = vmax.f32 %v435_v2, 0.0  ;;  %v715_v7 = vor.u32 %v714_v4, %v711_v3 }
  0xeb   : > { %v585_v9 = vld [vmem:[#allocation2 + $0x60] ss:$2 sm:$0xff]  ;;  %v601_v10 = vld [vmem:[#allocation2 + $0x61] ss:$2 sm:$0xff] }
  0xec   : > { %v610_v11 = vmax.f32 %v585_v9, %v601_v10  ;;  %v545_v12 = vmax.f32 %v496_v5, %v498_v6  ;;  %v725_v13 = vsel %vm699_vm4, %v715_v7, %v724_v8  ;;  %v716_v14 = vsel %vm699_vm4, %v1682_v15, %v715_v7 }
  0xed   : > { %v479_v16 = vpop.f32.mrf.mxu3  ;;  %775 = vrot.lane.b32.xlu0 %v725_v13, %s1543_s30  ;;  %773 = vrot.lane.b32.xlu1 %v716_v14, %s1543_s30  ;;  %v505_v5 = vmax.f32 %v453_v1, 0.0  ;;  %v455_v10 = vadd.f32 %v1634_v24, %v1638_v25 }
  0xee   : > { %v618_v17 = vpack.c.bf16 %v610_v11, %v610_v11  ;;  %562 = vst.msk [vmem:[#allocation2 + $0x28] sm:$0xff] %vm556_vm3, %v545_v12  ;;  %v480_v31 = vadd.f32 %v1634_v24, %v479_v16 }
  0xef   : > { %v437_v18 = vpop.f32.mrf.mxu0 }
  0xf0   : > { %626 = vst.msk [vmem:[#allocation3 + $0x3c] sm:$0xf] %vm519_vm2, %v618_v17  ;;  %v516_v34 = vmax.f32 %v480_v31, 0.0  ;;  %v438_v35 = vadd.f32 %v1634_v24, %v437_v18  ;;  %v506_v17 = vmax.f32 %v455_v10, 0.0  ;;  %v1445_v31 = vld [vmem:[%s1867_s3 + $0x78] sm:$0xff] }
  0xf1   : > { %1130 = vmatpush.bf16.msra.mxu2 %v1445_v31 }
  0xf2   : > { %v499_v41 = vmax.f32 %v438_v35, 0.0 }
  0xf5   : > { %v577_v20 = vld [vmem:[#allocation2 + $0x20] ss:$2 sm:$0xff]  ;;  %v593_v22 = vld [vmem:[#allocation2 + $0x21] ss:$2 sm:$0xff]  ;;  %v482_v23 = vpop.f32.mrf.mxu3  ;;  %808 = vrot.lane.b32.xlu0 %v715_v7, %s1543_s30 }
  0xf6   : > { %v606_v15 = vmax.f32 %v577_v20, %v593_v22  ;;  %v483_v27 = vadd.f32 %v1634_v24, %v482_v23 }
  0xf7   : > { %v439_v28 = vpop.f32.mrf.mxu0  ;;  %v1737_v14 = vld [vmem:[#allocation3 + $0x38] sm:$0xff]  }
  0xf8   : > { %v614_v29 = vpack.c.bf16 %v606_v15, %v606_v15  ;;  %v517_v30 = vmax.f32 %v483_v27, 0.0  ;;  %v440_v51 = vadd.f32 %v1634_v24, %v439_v28  ;;  %v1473_v20 = vunpack.c.h.b16 %v1737_v14  ;;  %v1520_v15 = vld [vmem:[#allocation3 + $0x34] sm:$0xff]  }
  0xf9   : > { %v1437_v27 = vld [vmem:[%s1867_s3 + $0x38] sm:$0xff] }
  0xfa   : > { %622 = vst.msk [vmem:[#allocation3 + $0x1c] sm:$0xf] %vm519_vm2, %v614_v29  ;;  %v554_v32 = vmax.f32 %v515_v26, %v517_v30  ;;  %v500_v57 = vmax.f32 %v440_v51, 0.0  ;;  %v1436_v30 = vld [vmem:[%s1867_s3 + $0x30] sm:$0xff]  ;;  %1089 = vmatpush.bf16.msra.mxu1 %v1437_v27 }
  0xfc   : > { %571 = vst.msk [vmem:[#allocation2 + $0x70] sm:$0xff] %vm556_vm3, %v554_v32 }
  0xfd   : > { %v484_v33 = vpop.f32.mrf.mxu3 }
  0xfe   : > { %v485_v36 = vadd.f32 %v1634_v24, %v484_v33  ;;  %1090 = vmatpush.bf16.msra.mxu1 %v1436_v30 }
  0xff   : > { %v442_v37 = vpop.f32.mrf.mxu0 }
 0x100   : > { %v518_v38 = vmax.f32 %v485_v36, 0.0  ;;  %v443_v39 = vadd.f32 %v1634_v24, %v442_v37  ;;  %v1444_v37 = vld [vmem:[%s1867_s3 + $0x70] sm:$0xff] }
 0x101   : > { %v1515_v40 = vld [vmem:[#allocation3 + $0x1c] sm:$0xff]   ;;  %1131 = vmatpush.bf16.msra.mxu2 %v1444_v37 }
 0x102   : > { %v555_v42 = vmax.f32 %v516_v34, %v518_v38  ;;  %v501_v43 = vmax.f32 %v443_v39, 0.0  ;;  %v727_v44 = vshrl.u32 %v1515_v40, 16  ;;  %v730_v47 = vshll.u32 %v1515_v40, 16 }
 0x103   : > { %v754_v39 = vshrl.u32 %v1520_v15, 16  ;;  %v757_v40 = vshll.u32 %v1520_v15, 16 }
 0x104   : > { %572 = vst.msk [vmem:[#allocation2 + $0x78] sm:$0xff] %vm556_vm3, %v555_v42  ;;  %v546_v48 = vmax.f32 %v499_v41, %v501_v43  ;;  %v729_v49 = vrot.slane %v727_v44, 4  ;;  %v732_v50 = vrot.slane %v730_v47, 5  ;;  %v1435_v47 = vld [vmem:[%s1867_s3 + $0x28] sm:$0xff] }
 0x105   : > { %v759_v51 = vrot.slane %v757_v40, 5  ;;  %1091 = vmatpush.bf16.msra.mxu1 %v1435_v47 }
 0x106   : > { %563 = vst.msk [vmem:[#allocation2 + $0x30] sm:$0xff] %vm556_vm3, %v546_v48  ;;  %v733_v53 = vor.u32 %v732_v50, %v729_v49  ;;  %v647_v48 = vld [vmem:[#allocation3 + $0x48] sm:$0xf]  ;;  %v756_v50 = vrot.slane %v754_v39, 4 }
 0x107   : > { %v444_v52 = vpop.f32.mrf.mxu0  ;;  %v1443_v49 = vld [vmem:[%s1867_s3 + $0x68] sm:$0xff] }
 0x108   : > { %v445_v55 = vadd.f32 %v1634_v24, %v444_v52  ;;  %v734_v56 = vsel %vm699_vm4, %v724_v8, %v733_v53  ;;  %1132 = vmatpush.bf16.msra.mxu2 %v1443_v49 }
 0x109   : > { %777 = vrot.lane.b32.xlu2 %v734_v56, %s1543_s30  ;;  %v1434_v56 = vld [vmem:[%s1867_s3 + $0x20] sm:$0xff] }
 0x10a   : > { %v502_v58 = vmax.f32 %v445_v55, 0.0  ;;  %v1770_v55 = vunpack.c.l.b16 %v647_v48  ;;  %1092 = vmatpush.bf16.msra.mxu1 %v1434_v56 }
 0x10b   : > { %v587_v59 = vld [vmem:[#allocation2 + $0x70] ss:$2 sm:$0xff]  ;;  %v603_v60 = vld [vmem:[#allocation2 + $0x71] ss:$2 sm:$0xff] }
 0x10c   : > { %v611_v63 = vmax.f32 %v587_v59, %v603_v60  ;;  %v547_v0 = vmax.f32 %v500_v57, %v502_v58  ;;  %v1442_v57 = vld [vmem:[%s1867_s3 + $0x60] sm:$0xff]  ;;  %v760_v58 = vor.u32 %v759_v51, %v756_v50 }
 0x10d   : > { %1133 = vmatpush.bf16.msra.mxu2 %v1442_v57 }
 0x10e   : > { %v619_v2 = vpack.c.bf16 %v611_v63, %v611_v63  ;;  %564 = vst.msk [vmem:[#allocation2 + $0x38] sm:$0xff] %vm556_vm3, %v547_v0  ;;  %v1433_v0 = vld [vmem:[%s1867_s3 + $0x18] sm:$0xff] }
 0x10f   : > { %v447_v3 = vpop.f32.mrf.mxu0  ;;  %1093 = vmatpush.bf16.msra.mxu1 %v1433_v0 }
 0x110   : > { %627 = vst.msk [vmem:[#allocation3 + $0x44] sm:$0xf] %vm519_vm2, %v619_v2  ;;  %v448_v4 = vadd.f32 %v1634_v24, %v447_v3 }
 0x112   : > { %v503_v6 = vmax.f32 %v448_v4, 0.0 }
 0x114   : > { %v548_v7 = vmax.f32 %v503_v6, %v505_v5 }
 0x115   : > { %v579_v8 = vld [vmem:[#allocation2 + $0x30] ss:$2 sm:$0xff]  ;;  %v595_v9 = vld [vmem:[#allocation2 + $0x31] ss:$2 sm:$0xff] }
 0x116   : > { %v607_v11 = vmax.f32 %v579_v8, %v595_v9  ;;  %565 = vst.msk [vmem:[#allocation2 + $0x40] sm:$0xff] %vm556_vm3, %v548_v7  ;;  %v1432_v7 = vld [vmem:[%s1867_s3 + $0x10] sm:$0xff] }
 0x117   : > { %v449_v21 = vpop.f32.mrf.mxu0  ;;  %v1739_v16 = vld [vmem:[#allocation3 + $0x40] sm:$0xff]   ;;  %1094 = vmatpush.bf16.msra.mxu1 %v1432_v7 }
 0x118   : > { %v615_v12 = vpack.c.bf16 %v607_v11, %v607_v11  ;;  %v450_v13 = vadd.f32 %v1634_v24, %v449_v21  ;;  %v1744_v25 = vunpack.c.l.b16 %v1739_v16 }
 0x11a   : > { %623 = vst.msk [vmem:[#allocation3 + $0x24] sm:$0xf] %vm519_vm2, %v615_v12  ;;  %v504_v18 = vmax.f32 %v450_v13, 0.0  ;;  %v698_v22 = vpack.c.b16 %v1744_v25, %v1473_v20  ;;  %v1431_v13 = vld [vmem:[%s1867_s3 + $0x8] sm:$0xff]  ;;  %v1440_v20 = vld [vmem:[%s1867_s3 + $0x50] sm:$0xff] }
 0x11b   : > { %1095 = vmatpush.bf16.msra.mxu1 %v1431_v13 }
 0x11c   : > { %v549_v19 = vmax.f32 %v504_v18, %v506_v17  ;;  %v763_v28 = vshrl.u32 %v698_v22, 16  ;;  %v766_v29 = vshll.u32 %v698_v22, 16  ;;  %v1441_v17 = vld [vmem:[%s1867_s3 + $0x58] sm:$0xff]  ;;  %v1439_v22 = vld [vmem:[%s1867_s3 + $0x48] sm:$0xff] }
 0x11d   : > { %1134 = vmatpush.bf16.msra.mxu2 %v1441_v17 }
 0x11e   : > { %566 = vst.msk [vmem:[#allocation2 + $0x48] sm:$0xff] %vm556_vm3, %v549_v19  ;;  %v765_v43 = vrot.slane %v763_v28, 4  ;;  %v768_v44 = vrot.slane %v766_v29, 5  ;;  %v1430_v19 = vld [vmem:[%s1867_s3] sm:$0xff] }
 0x11f   : > { %1096 = vmatpush.bf16.msra.mxu1 %v1430_v19 }
 0x120   : > { %v769_v52 = vor.u32 %v768_v44, %v765_v43 }
 0x121   : > { %v1517_v23 = vld [vmem:[#allocation3 + $0x24] sm:$0xff]   ;;  %1135 = vmatpush.bf16.msra.mxu2 %v1440_v20 }
 0x122   : > { %v736_v24 = vshrl.u32 %v1517_v23, 16  ;;  %v739_v26 = vshll.u32 %v1517_v23, 16  ;;  %v770_v59 = vsel %vm699_vm4, %v760_v58, %v769_v52  ;;  %v1438_v23 = vld [vmem:[%s1867_s3 + $0x40] sm:$0xff] }
 0x123   : > { %v1481_v7 = vld [vmem:[#allocation3 + $0x20] sm:$0xff]  }
 0x124   : > { %v738_v34 = vrot.slane %v736_v24, 4  ;;  %v741_v35 = vrot.slane %v739_v26, 5  ;;  %v628_v24 = vld [vmem:[#allocation3] sm:$0x8] }
 0x125   : > { %v581_v32 = vld [vmem:[#allocation2 + $0x40] ss:$2 sm:$0xff]  ;;  %v597_v33 = vld [vmem:[#allocation2 + $0x41] ss:$2 sm:$0xff]  ;;  %1136 = vmatpush.bf16.msra.mxu2 %v1439_v22  ;;  %v665_v26 = vunpack.c.l.b16 %v628_v24 }
 0x126   : > { %v608_v36 = vmax.f32 %v581_v32, %v597_v33  ;;  %v742_v38 = vor.u32 %v741_v35, %v738_v34  ;;  %v645_v33 = vld [vmem:[#allocation3 + $0x8] sm:$0x8] }
 0x127   : > { %v682_v15 = vpack.c.b16 %v666_v61, %v665_v26  ;;  %v792_v54 = vunpack.c.l.b16 %v645_v33 }
 0x128   : > { %v616_v41 = vpack.c.bf16 %v608_v36, %v608_v36  ;;  %v743_v42 = vsel %vm699_vm4, %v733_v53, %v742_v38  ;;  %v1477_v53 = vunpack.c.h.b16 %v1739_v16 }
 0x129   : > { %779 = vrot.lane.b32.xlu2 %v743_v42, %s1543_s30  ;;  %1137 = vmatpush.bf16.msra.mxu2 %v1438_v23  ;;  %v795_v47 = vpack.c.b16 %v1449_v45, %v792_v54 }
 0x12a   : > { %624 = vst.msk [vmem:[#allocation3 + $0x2c] sm:$0xf] %vm519_vm2, %v616_v41  ;;  %v798_v63 = vpack.c.b16 %v1770_v55, %v1477_v53 }
 0x12c   : > { %v800_v5 = vshrl.u32 %v798_v63, 16  ;;  %v803_v6 = vshll.u32 %v798_v63, 16  ;;  %v1480_v63 = vld [vmem:[#allocation3 + $0x18] sm:$0xff]  }
 0x12e   : > { %v802_v11 = vrot.slane %v800_v5, 4  ;;  %v805_v21 = vrot.slane %v803_v6, 5 }
 0x130   : > { %v806_v12 = vor.u32 %v805_v21, %v802_v11 }
 0x131   : > { %v1519_v60 = vld [vmem:[#allocation3 + $0x2c] sm:$0xff]   ;;  %785 = vrot.lane.b32.xlu2 %v770_v59, %s1543_s30 }
 0x132   : > { %v745_v1 = vshrl.u32 %v1519_v60, 16  ;;  %v748_v2 = vshll.u32 %v1519_v60, 16  ;;  %v807_v18 = vsel %vm699_vm4, %v769_v52, %v806_v12 }
 0x134   : > { %v747_v3 = vrot.slane %v745_v1, 4  ;;  %v750_v4 = vrot.slane %v748_v2, 5 }
 0x136   : > { %v751_v8 = vor.u32 %v750_v4, %v747_v3 }
 0x138   : > { %v752_v9 = vsel %vm699_vm4, %v742_v38, %v751_v8  ;;  %v761_v10 = vsel %vm699_vm4, %v751_v8, %v760_v58 }
 0x139   : > { %787 = vrot.lane.b32.xlu2 %v769_v52, %s1543_s30  ;;  %781 = vrot.lane.b32.xlu0 %v752_v9, %s1543_s30 }
 0x13a   : > { %783 = vrot.lane.b32.xlu1 %v761_v10, %s1543_s30 }
 0x13e   : > { %v772_v27 = vpop.permute.xlu1 %771 }
 0x13f   : > { %v816_v28 = vsel %vm556_vm3, %v682_v15, %v772_v27 }
 0x140   : > { %v887_v29 = vshrl.u32 %v816_v28, 16  ;;  %v890_v30 = vshll.u32 %v816_v28, 16  ;;  %v1483_v28 = vld [vmem:[#allocation3 + $0x30] sm:$0xff]  }
 0x141   : > { %810 = vrot.lane.b32.xlu0 %v807_v18, %s1543_s30  ;;  %v1482_v18 = vld [vmem:[#allocation3 + $0x28] sm:$0xff]  }
 0x142   : > { %812 = vrot.lane.b32.xlu1 %v806_v12, %s1543_s30  ;;  %v889_v35 = vrot.slane %v887_v29, 3  ;;  %v892_v36 = vrot.slane %v890_v30, 4 }
 0x144   : > { %v893_v43 = vor.u32 %v892_v36, %v889_v35 }
 0x15f   : > { %v776_v31 = vpop.permute.xlu0 %775  ;;  %v774_v32 = vpop.permute.xlu1 %773 }
 0x160   : > { %v819_v34 = vsel %vm556_vm3, %v1673_v62, %v774_v32  ;;  %v822_v39 = vsel %vm556_vm3, %v1697_v46, %v776_v31 }
 0x161   : > { %v894_v37 = vshrl.u32 %v819_v34, 16  ;;  %v897_v38 = vshll.u32 %v819_v34, 16  ;;  %v909_v41 = vshrl.u32 %v822_v39, 16  ;;  %v912_v42 = vshll.u32 %v822_v39, 16 }
 0x163   : > { %v896_v61 = vrot.slane %v894_v37, 3  ;;  %v899_v40 = vrot.slane %v897_v38, 4  ;;  %v911_v51 = vrot.slane %v909_v41, 3  ;;  %v914_v52 = vrot.slane %v912_v42, 4  ;;  %v778_v58 = vpop.permute.xlu2 %777 }
 0x164   : > { %v825_v62 = vsel %vm556_vm3, %v1480_v63, %v778_v58 }
 0x165   : > { %v900_v44 = vor.u32 %v899_v40, %v896_v61  ;;  %v915_v60 = vor.u32 %v914_v52, %v911_v51  ;;  %v918_v45 = vshrl.u32 %v825_v62, 16  ;;  %v921_v1 = vshll.u32 %v825_v62, 16 }
 0x167   : > { %v809_v48 = vpop.permute.xlu0 %808  ;;  %v901_v49 = vsel %vm886_vm5, %v893_v43, %v900_v44  ;;  %v920_v2 = vrot.slane %v918_v45, 3  ;;  %v923_v3 = vrot.slane %v921_v1, 4  ;;  %v917_v4 = vsel %vm886_vm5, %v900_v44, %v915_v60 }
 0x168   : > { %v843_v50 = vsel %vm556_vm3, %v795_v47, %v809_v48  ;;  %1097 = vmatmul.bf16.vlgmr.msra.gmra.mxu1 %v901_v49  ;;  %v690_v44 = vpack.c.b16 %v1744_v25, %v1744_v25  ;;  %v797_v25 = vpack.c.b16 %v1770_v55, %v1770_v55 }
 0x169   : > { %v902_v46 = vshrl.u32 %v843_v50, 16  ;;  %v905_v53 = vshll.u32 %v843_v50, 16  ;;  %v924_v5 = vor.u32 %v923_v3, %v920_v2 }
 0x16b   : > { %v904_v56 = vrot.slane %v902_v46, 3  ;;  %v907_v57 = vrot.slane %v905_v53, 4  ;;  %v925_v6 = vsel %vm886_vm5, %v915_v60, %v924_v5 }
 0x16d   : > { %v908_v59 = vor.u32 %v907_v57, %v904_v56 }
 0x16f   : > { %v916_v0 = vsel %vm886_vm5, %v908_v59, %v915_v60 }
 0x170   : > { %1138 = vmatmul.bf16.vlgmr.msra.gmra.mxu2 %v916_v0 }
 0x178   : > { %1101 = vmatmul.bf16.gmra.mxu1 %v917_v4 }
 0x180   : > { %1142 = vmatmul.bf16.gmra.mxu2 %v925_v6 }
 0x183   : > { %v780_v8 = vpop.permute.xlu2 %779 }
 0x184   : > { %v828_v9 = vsel %vm556_vm3, %v1481_v7, %v780_v8 }
 0x185   : > { %v926_v10 = vshrl.u32 %v828_v9, 16  ;;  %v929_v11 = vshll.u32 %v828_v9, 16  ;;  %v1533_v9 = vld [vmem:[%s1868_s4] ss:$0 sm:$0xff] }
 0x187   : > { %v928_v21 = vrot.slane %v926_v10, 3  ;;  %v931_v12 = vrot.slane %v929_v11, 4 }
 0x188   : > { %1105 = vmatmul.bf16.gmra.mxu1 %v925_v6 }
 0x189   : > { %v932_v13 = vor.u32 %v931_v12, %v928_v21 }
 0x18b   : > { %v933_v17 = vsel %vm886_vm5, %v924_v5, %v932_v13  ;;  %v786_v36 = vpop.permute.xlu2 %785 }
 0x18c   : > { %v837_v38 = vsel %vm556_vm3, %v1737_v14, %v786_v36 }
 0x18d   : > { %v950_v39 = vshrl.u32 %v837_v38, 16  ;;  %v953_v54 = vshll.u32 %v837_v38, 16 }
 0x18f   : > { %v952_v61 = vrot.slane %v950_v39, 3  ;;  %v955_v40 = vrot.slane %v953_v54, 4 }
 0x190   : > { %1146 = vmatmul.bf16.gmra.mxu2 %v933_v17 }
 0x191   : > { %v956_v43 = vor.u32 %v955_v40, %v952_v61 }
 0x193   : > { %v788_v41 = vpop.permute.xlu2 %787 }
 0x194   : > { %v840_v48 = vsel %vm556_vm3, %v690_v44, %v788_v41 }
 0x195   : > { %v966_v14 = vshrl.u32 %v840_v48, 16  ;;  %v969_v50 = vshll.u32 %v840_v48, 16 }
 0x197   : > { %v968_v46 = vrot.slane %v966_v14, 3  ;;  %v971_v53 = vrot.slane %v969_v50, 4 }
 0x198   : > { %1109 = vmatmul.bf16.gmra.mxu1 %v933_v17 }
 0x199   : > { %v972_v58 = vor.u32 %v971_v53, %v968_v46 }
 0x19b   : > { %v973_v63 = vsel %vm886_vm5, %v956_v43, %v972_v58 }
 0x1ab   : > { %v782_v19 = vpop.permute.xlu0 %781 }
 0x1ac   : > { %v831_v20 = vsel %vm556_vm3, %v1482_v18, %v782_v19  ;;  %v784_v15 = vpop.permute.xlu1 %783 }
 0x1ad   : > { %v934_v22 = vshrl.u32 %v831_v20, 16  ;;  %v937_v23 = vshll.u32 %v831_v20, 16  ;;  %v834_v30 = vsel %vm556_vm3, %v1483_v28, %v784_v15 }
 0x1ae   : > { %v942_v31 = vshrl.u32 %v834_v30, 16  ;;  %v945_v32 = vshll.u32 %v834_v30, 16 }
 0x1af   : > { %v936_v24 = vrot.slane %v934_v22, 3  ;;  %v939_v26 = vrot.slane %v937_v23, 4 }
 0x1b0   : > { %v944_v33 = vrot.slane %v942_v31, 3  ;;  %v947_v34 = vrot.slane %v945_v32, 4 }
 0x1b1   : > { %v940_v27 = vor.u32 %v939_v26, %v936_v24 }
 0x1b2   : > { %v948_v35 = vor.u32 %v947_v34, %v944_v33 }
 0x1b3   : > { %v941_v29 = vsel %vm886_vm5, %v932_v13, %v940_v27  ;;  %v811_v42 = vpop.permute.xlu0 %810 }
 0x1b4   : > { %1113 = vmatmul.bf16.gmra.mxu1 %v941_v29  ;;  %1150 = vmatmul.bf16.gmra.mxu2 %v941_v29  ;;  %v949_v37 = vsel %vm886_vm5, %v940_v27, %v948_v35  ;;  %v957_v47 = vsel %vm886_vm5, %v948_v35, %v956_v43  ;;  %v846_v49 = vsel %vm556_vm3, %v1739_v16, %v811_v42  ;;  %v813_v60 = vpop.permute.xlu1 %812 }
 0x1b5   : > { %v958_v51 = vshrl.u32 %v846_v49, 16  ;;  %v961_v52 = vshll.u32 %v846_v49, 16  ;;  %v849_v0 = vsel %vm556_vm3, %v797_v25, %v813_v60 }
 0x1b6   : > { %v974_v45 = vshrl.u32 %v849_v0, 16  ;;  %v977_v1 = vshll.u32 %v849_v0, 16 }
 0x1b7   : > { %v960_v56 = vrot.slane %v958_v51, 3  ;;  %v963_v57 = vrot.slane %v961_v52, 4 }
 0x1b8   : > { %v976_v2 = vrot.slane %v974_v45, 3  ;;  %v979_v3 = vrot.slane %v977_v1, 4 }
 0x1b9   : > { %v964_v59 = vor.u32 %v963_v57, %v960_v56 }
 0x1ba   : > { %v980_v5 = vor.u32 %v979_v3, %v976_v2 }
 0x1bb   : > { %v965_v16 = vsel %vm886_vm5, %v956_v43, %v964_v59 }
 0x1bc   : > { %v981_v7 = vsel %vm886_vm5, %v964_v59, %v980_v5 }
 0x1c4   : > { %1117 = vmatmul.bf16.gmra.mxu1 %v949_v37  ;;  %1154 = vmatmul.bf16.gmra.mxu2 %v949_v37 }
 0x1d4   : > { %1121 = vmatmul.bf16.gmra.mxu1 %v957_v47  ;;  %1158 = vmatmul.bf16.gmra.mxu2 %v957_v47 }
 0x1e4   : > { %1125 = vmatmul.bf16.gmra.mxu1 %v973_v63  ;;  %1162 = vmatmul.bf16.gmra.mxu2 %v965_v16 }
 0x1e5   : > { %v1098_v62 = vpop.f32.mrf.mxu1 }
 0x1e6   : > { %v1099_v11 = vadd.f32 %v1533_v9, %v1098_v62 }
 0x1ed   : > { %v1100_v4 = vpop.f32.mrf.mxu1 }
 0x1f3   : > { %v1139_v6 = vpop.f32.mrf.mxu2 }
 0x1f4   : > { %1166 = vmatmul.bf16.gmra.mxu2 %v981_v7  ;;  %v1140_v21 = vadd.f32 %v1139_v6, %v1099_v11 }
 0x1f5   : > { %v1102_v55 = vpop.f32.mrf.mxu1 }
 0x1f6   : > { %v1103_v12 = vadd.f32 %v1533_v9, %v1102_v55  ;;  %v1171_v19 = vmax.f32 %v1140_v21, 0.0 }
 0x1fb   : > { %v1141_v8 = vpop.f32.mrf.mxu2 }
 0x1fd   : > { %v1104_v10 = vpop.f32.mrf.mxu1 }
 0x203   : > { %v1143_v13 = vpop.f32.mrf.mxu2 }
 0x204   : > { %v1144_v17 = vadd.f32 %v1143_v13, %v1103_v12 }
 0x205   : > { %v1106_v18 = vpop.f32.mrf.mxu1 }
 0x206   : > { %v1172_v20 = vmax.f32 %v1144_v17, 0.0  ;;  %v1107_v30 = vadd.f32 %v1533_v9, %v1106_v18 }
 0x208   : > { %v1179_v22 = vmax.f32 %v1171_v19, %v1172_v20 }
 0x20a   : > { %1183 = vst.msk [vmem:[#allocation4] sm:$0xff] %vm556_vm3, %v1179_v22 }
 0x20b   : > { %v1145_v23 = vpop.f32.mrf.mxu2 }
 0x20d   : > { %v1108_v24 = vpop.f32.mrf.mxu1 }
 0x213   : > { %v1147_v26 = vpop.f32.mrf.mxu2 }
 0x214   : > { %v1148_v31 = vadd.f32 %v1147_v26, %v1107_v30 }
 0x215   : > { %v1110_v15 = vpop.f32.mrf.mxu1 }
 0x216   : > { %v1111_v32 = vadd.f32 %v1533_v9, %v1110_v15  ;;  %v1173_v36 = vmax.f32 %v1148_v31, 0.0 }
 0x21b   : > { %v1149_v27 = vpop.f32.mrf.mxu2 }
 0x21d   : > { %v1112_v28 = vpop.f32.mrf.mxu1 }
 0x231   : > { %v1114_v29 = vpop.f32.mrf.mxu1 }
 0x232   : > { %v1115_v43 = vadd.f32 %v1533_v9, %v1114_v29 }
 0x237   : > { %v1151_v33 = vpop.f32.mrf.mxu2 }
 0x238   : > { %v1152_v34 = vadd.f32 %v1151_v33, %v1111_v32 }
 0x239   : > { %v1116_v35 = vpop.f32.mrf.mxu1 }
 0x23a   : > { %v1174_v37 = vmax.f32 %v1152_v34, 0.0 }
 0x23c   : > { %v1180_v38 = vmax.f32 %v1173_v36, %v1174_v37 }
 0x23e   : > { %1184 = vst.msk [vmem:[#allocation4 + $0x8] sm:$0xff] %vm556_vm3, %v1180_v38 }
 0x23f   : > { %v1153_v39 = vpop.f32.mrf.mxu2 }
 0x241   : > { %v1118_v54 = vpop.f32.mrf.mxu1 }
 0x242   : > { %v1119_v44 = vadd.f32 %v1533_v9, %v1118_v54 }
 0x245   : > { %v1187_v2 = vld [vmem:[#allocation4] ss:$2 sm:$0xff]  ;;  %v1191_v3 = vld [vmem:[#allocation4 + $0x1] ss:$2 sm:$0xff] }
 0x246   : > { %v1194_v4 = vmax.f32 %v1187_v2, %v1191_v3 }
 0x247   : > { %v1155_v61 = vpop.f32.mrf.mxu2 }
 0x248   : > { %v1156_v47 = vadd.f32 %v1155_v61, %v1115_v43  ;;  %v1196_v55 = vsel %vm556_vm3, %v1194_v4, 0.0 }
 0x249   : > { %v1120_v40 = vpop.f32.mrf.mxu1 }
 0x24a   : > { %v1175_v50 = vmax.f32 %v1156_v47, 0.0 }
 0x24f   : > { %v1157_v41 = vpop.f32.mrf.mxu2 }
 0x251   : > { %v1122_v42 = vpop.f32.mrf.mxu1 }
 0x252   : > { %v1123_v59 = vadd.f32 %v1533_v9, %v1122_v42 }
 0x257   : > { %v1159_v48 = vpop.f32.mrf.mxu2 }
 0x258   : > { %v1160_v49 = vadd.f32 %v1159_v48, %v1119_v44 }
 0x259   : > { %v1124_v14 = vpop.f32.mrf.mxu1 }
 0x25a   : > { %v1176_v51 = vmax.f32 %v1160_v49, 0.0 }
 0x25c   : > { %v1181_v52 = vmax.f32 %v1175_v50, %v1176_v51 }
 0x25e   : > { %1185 = vst.msk [vmem:[#allocation4 + $0x10] sm:$0xff] %vm556_vm3, %v1181_v52 }
 0x25f   : > { %v1161_v46 = vpop.f32.mrf.mxu2 }
 0x261   : > { %v1126_v53 = vpop.f32.mrf.mxu1 }
 0x262   : > { %v1127_v25 = vadd.f32 %v1533_v9, %v1126_v53 }
 0x267   : > { %v1163_v56 = vpop.f32.mrf.mxu2 }
 0x268   : > { %v1164_v60 = vadd.f32 %v1163_v56, %v1123_v59 }
 0x269   : > { %v1128_v57 = vpop.f32.mrf.mxu1 }
 0x26a   : > { %v1177_v0 = vmax.f32 %v1164_v60, 0.0 }
 0x26f   : > { %v1165_v58 = vpop.f32.mrf.mxu2 }
 0x277   : > { %v1167_v63 = vpop.f32.mrf.mxu2 }
 0x278   : > { %v1168_v16 = vadd.f32 %v1167_v63, %v1127_v25 }
 0x27a   : > { %v1178_v62 = vmax.f32 %v1168_v16, 0.0 }
 0x27c   : > { %v1182_v45 = vmax.f32 %v1177_v0, %v1178_v62 }
 0x27e   : > { %1186 = vst.msk [vmem:[#allocation4 + $0x18] sm:$0xff] %vm556_vm3, %v1182_v45 }
 0x27f   : > { %v1169_v1 = vpop.f32.mrf.mxu2 }
 0x285   : > { %v1189_v5 = vld [vmem:[#allocation4 + $0x10] ss:$2 sm:$0xff]  ;;  %v1193_v6 = vld [vmem:[#allocation4 + $0x11] ss:$2 sm:$0xff] }
 0x286   : > { %v1195_v7 = vmax.f32 %v1189_v5, %v1193_v6 }
 0x288   : > { %v1197_v8 = vsel %vm556_vm3, %v1195_v7, 0.0 }
 0x289   : > { %v1198_v9 = vadd.f32 %v1197_v8, %v1196_v55 }
 0x28b   : > { %v1199_v10 = vrot.slane %v1198_v9, 4 }
 0x28d   : > { %v1200_v11 = vadd.f32 %v1199_v10, %v1198_v9 }
 0x28f   : > { %v1201_v21 = vrot.slane %v1200_v11, 2 }
 0x291   : > { %v1202_v12 = vadd.f32 %v1201_v21, %v1200_v11 }
 0x293   : > { %v1203_v13 = vrot.slane %v1202_v12, 1 }
 0x295   : > { %v1204_v17 = vadd.f32 %v1203_v13, %v1202_v12 }
 0x297   : > { %v1205_v18 = vmul.f32 0.0625, %v1204_v17 }
 0x299   : > { %1207 = vst.msk [vmem:[%s220_s21] sm:$0x1] %vm1206_vm6, %v1205_v18 }
 0x29a PF: > { %s15_s18 = sadd.s32 1, %s1540_s18  }
 0x29b   : > { %p12_p4 = scmp.ge.s32.totalorder %s15_s18, 4  }
 0x29d   :  { %14 = sbr.rel (!%p12_p4) target bundleno = 1 (0x1), region = 88 }

</bundles_post_ra>
